<compile_context>
chip_gen: v7x
topology: tpu7x:2x2x1
jax: 0.10.0
libtpu: 0.0.40
codegen_flags: <defaults>
</compile_context>

<pallas_src>
import functools

import jax
import jax.numpy as jnp
from jax.experimental import pallas as pl
from jax.experimental.pallas import tpu as pltpu


def gbam_kernel(x_ref, w1_ref, b1_ref, w2_ref, b2_ref, o_ref, acc_ref,
                *, n_total, tn):
    n = pl.program_id(1)
    last = pl.num_programs(1) - 1

    # --- init accumulator at the first token tile of this batch tile ---------
    @pl.when(n == 0)
    def _():
        acc_ref[...] = jnp.zeros_like(acc_ref)

    # --- streamed partial sum over the token axis (pure VPU adds, f32 acc) ---
    if n_total % tn != 0:
        # Only the final tile is partial; keep the mask off the hot path.
        @pl.when(n < last)
        def _():
            acc_ref[...] += jnp.sum(x_ref[...], axis=1, dtype=jnp.float32)

        @pl.when(n == last)
        def _():
            x = x_ref[...]                                    # (tb, tn, D)
            tok = jax.lax.broadcasted_iota(jnp.int32, (1, tn, 1), 1) + n * tn
            x = jnp.where(tok < n_total, x, jnp.zeros_like(x))
            acc_ref[...] += jnp.sum(x, axis=1, dtype=jnp.float32)
    else:
        acc_ref[...] += jnp.sum(x_ref[...], axis=1, dtype=jnp.float32)

    # --- finalize: mean -> Linear -> ReLU -> Linear -> Sigmoid ---------------
    @pl.when(n == last)
    def _():
        avg = acc_ref[...] * jnp.float32(1.0 / n_total)       # (tb, D)
        h = jnp.dot(avg, w1_ref[...].astype(jnp.float32),
                    preferred_element_type=jnp.float32) + b1_ref[...].astype(jnp.float32)
        h = jnp.maximum(h, 0.0)                                # ReLU
        y = jnp.dot(h, w2_ref[...].astype(jnp.float32),
                    preferred_element_type=jnp.float32) + b2_ref[...].astype(jnp.float32)
        o_ref[...] = jax.nn.sigmoid(y).astype(o_ref.dtype)     # Sigmoid


def _round_up(v, m):
    return ((v + m - 1) // m) * m


def _vmem_cap_bytes():
    """Generation-aware scoped-VMEM cap: physical VMEM minus ~16 MiB headroom."""
    try:
        phys = int(pltpu.get_tpu_info().vmem_capacity_bytes)
    except Exception:
        phys = 64 * 1024 * 1024            # conservative: assume v7x (64 MiB/TC)
    return max(phys - 16 * 1024 * 1024, 32 * 1024 * 1024)


def global_band_amplification(x, w1, b1, w2, b2, *, tb=None, tn=None):
    """x: (B, N, D); w1: (D, H); b1: (H,); w2: (H, D); b2: (D,). Returns (B, D)."""
    B, N, D = x.shape
    H = w1.shape[1]
    itemsize = jnp.dtype(x.dtype).itemsize

    # --- batch tile: split into >=2 programs when B >= 16 (v7x dual-TC) ------
    if tb is None:
        if B >= 16:
            tb = min(_round_up(-(-B // 2), 8), 256)
        else:
            tb = B
        # Guard: even a minimal (tn=8) double-buffered x tile must stay modest.
        while tb > 8 and 2 * tb * 8 * D * itemsize > 16 * 1024 * 1024:
            tb = max(8, _round_up(tb // 2, 8))
    assert tb == B or tb % 8 == 0, "batch tile must be a multiple of 8 or full B"

    # --- token tile: ~4 MiB per streamed x buffer ----------------------------
    if tn is None:
        budget = 4 * 1024 * 1024
        tn_cap = max(8, (budget // (tb * D * itemsize)) // 8 * 8)
        tn = N if N <= tn_cap else tn_cap
    assert tn == N or tn % 8 == 0, "token tile must be a multiple of 8 or full N"

    grid = (pl.cdiv(B, tb), pl.cdiv(N, tn))   # reduction (N) axis last

    # Biases as 2D rows for TPU-friendly layouts.
    b1_2d = b1.reshape(1, H)
    b2_2d = b2.reshape(1, D)

    # --- scoped-VMEM request: actual footprint + slack, generation-aware cap --
    w_bytes = 2 * ((D * H + H) * jnp.dtype(w1.dtype).itemsize
                   + (H * D + D) * jnp.dtype(w2.dtype).itemsize)
    x_bytes = 2 * tb * tn * D * itemsize       # double-buffered streamed input
    out_bytes = 2 * tb * D * itemsize          # double-buffered output window
    acc_bytes = tb * D * 4                     # f32 accumulator scratch
    need = x_bytes + w_bytes + out_bytes + acc_bytes + (1 << 20)
    vmem_limit = int(min(max(need, 32 * 1024 * 1024), _vmem_cap_bytes()))

    kernel = functools.partial(gbam_kernel, n_total=N, tn=tn)

    # TODO(synk): for very small per-step x tiles (<~1 MiB), pipeline_mode=
    # pl.Buffered(3) on the x BlockSpec can hide DMA issue latency further.
    return pl.pallas_call(
        kernel,
        out_shape=jax.ShapeDtypeStruct((B, D), x.dtype),
        grid=grid,
        in_specs=[
            pl.BlockSpec((tb, tn, D), lambda b, n: (b, n, 0)),   # streamed x
            pl.BlockSpec((D, H), lambda b, n: (0, 0)),           # resident w1
            pl.BlockSpec((1, H), lambda b, n: (0, 0)),           # resident b1
            pl.BlockSpec((H, D), lambda b, n: (0, 0)),           # resident w2
            pl.BlockSpec((1, D), lambda b, n: (0, 0)),           # resident b2
        ],
        out_specs=pl.BlockSpec((tb, D), lambda b, n: (b, 0)),    # same block over n
        scratch_shapes=[pltpu.VMEM((tb, D), jnp.float32)],        # running sum
        compiler_params=pltpu.CompilerParams(
            dimension_semantics=("parallel", "arbitrary"),
            vmem_limit_bytes=vmem_limit,
        ),
    )(x, w1, b1_2d, w2, b2_2d)


def init_params(key, input_size):
    """Deterministic init mimicking nn.Linear defaults (uniform +/- 1/sqrt(fan_in))."""
    hidden = input_size // 16
    k1, k2, k3, k4 = jax.random.split(key, 4)
    bound1 = 1.0 / (input_size ** 0.5)
    bound2 = 1.0 / (hidden ** 0.5)
    w1 = jax.random.uniform(k1, (input_size, hidden), jnp.float32, -bound1, bound1)
    b1 = jax.random.uniform(k2, (hidden,), jnp.float32, -bound1, bound1)
    w2 = jax.random.uniform(k3, (hidden, input_size), jnp.float32, -bound2, bound2)
    b2 = jax.random.uniform(k4, (input_size,), jnp.float32, -bound2, bound2)
    return w1, b1, w2, b2


def _reference(x, w1, b1, w2, b2):
    avg = x.astype(jnp.float32).mean(axis=1)
    return jax.nn.sigmoid(jnp.maximum(avg @ w1 + b1, 0.0) @ w2 + b2).astype(x.dtype)


if __name__ == "__main__":
    key = jax.random.PRNGKey(0)
    k_x1, k_p1, k_x2, k_p2, k_x3 = jax.random.split(key, 5)

    # Test 1: D=128 (hidden=8), N=16 streamed in tn=8 tiles (grid over N).
    B, N, D = 2, 16, 128
    x = jax.random.normal(k_x1, (B, N, D), dtype=jnp.float32)
    w1, b1, w2, b2 = init_params(k_p1, D)
    out = jax.block_until_ready(global_band_amplification(x, w1, b1, w2, b2, tn=8))
    ref = _reference(x, w1, b1, w2, b2)
    assert out.shape == (B, D)
    assert jnp.allclose(out, ref, atol=1e-5, rtol=1e-5)

    # Test 2: PyTorch default input_size=200 (hidden=12), N=10 with a partial
    # (masked, epilogue-gated) token tile and non-128-multiple feature dim.
    B2, N2, D2 = 4, 10, 200
    x2 = jax.random.normal(k_x2, (B2, N2, D2), dtype=jnp.float32)
    w1b, b1b, w2b, b2b = init_params(k_p2, D2)
    out2 = jax.block_until_ready(
        global_band_amplification(x2, w1b, b1b, w2b, b2b, tn=8))
    ref2 = _reference(x2, w1b, b1b, w2b, b2b)
    assert out2.shape == (B2, D2)
    assert jnp.allclose(out2, ref2, atol=1e-5, rtol=1e-5)

    # Test 3: budget-derived tiles + batch-axis split (B>=16 -> 2 programs on
    # the parallel axis), streaming bf16 input with f32 accumulation.
    B3, N3, D3 = 16, 64, 128
    x3 = jax.random.normal(k_x3, (B3, N3, D3), dtype=jnp.float32).astype(jnp.bfloat16)
    out3 = jax.block_until_ready(global_band_amplification(x3, w1, b1, w2, b2))
    ref3 = _reference(x3, w1, b1, w2, b2)
    assert out3.shape == (B3, D3)
    assert jnp.allclose(out3.astype(jnp.float32), ref3.astype(jnp.float32),
                        atol=2e-2, rtol=2e-2)

    print("KERNEL_OK")
</pallas_src>

<mosaic_0001>
module attributes {stable_mosaic.version = 11 : i64} {
  func.func @gbam_kernel(%arg0: i32, %arg1: i32, %arg2: memref<2x8x128xf32, #tpu.memory_space<vmem>>, %arg3: memref<128x8xf32, #tpu.memory_space<vmem>>, %arg4: memref<1x8xf32, #tpu.memory_space<vmem>>, %arg5: memref<8x128xf32, #tpu.memory_space<vmem>>, %arg6: memref<1x128xf32, #tpu.memory_space<vmem>>, %arg7: memref<2x128xf32, #tpu.memory_space<vmem>>, %arg8: memref<2x128xf32, #tpu.memory_space<vmem>>) attributes {dimension_semantics = [#tpu.dimension_semantics<parallel>, #tpu.dimension_semantics<arbitrary>], iteration_bounds = array<i64: 1, 2>, scalar_prefetch = 0 : i64, scratch_operands = 1 : i64, tpu.core_type = #tpu.core_type<tc>, window_params = [{transform_indices = @transform_0, window_bounds = array<i64: 2, 8, 128>}, {pipeline_mode = #tpu.pipeline_mode<synchronous>, transform_indices = @transform_1, window_bounds = array<i64: 128, 8>}, {pipeline_mode = #tpu.pipeline_mode<synchronous>, transform_indices = @transform_2, window_bounds = array<i64: 1, 8>}, {pipeline_mode = #tpu.pipeline_mode<synchronous>, transform_indices = @transform_3, window_bounds = array<i64: 8, 128>}, {pipeline_mode = #tpu.pipeline_mode<synchronous>, transform_indices = @transform_4, window_bounds = array<i64: 1, 128>}, {transform_indices = @transform_5, window_bounds = array<i64: 2, 128>}]} {
    %c0_i32 = arith.constant 0 : i32
    %0 = arith.cmpi eq, %arg1, %c0_i32 : i32
    %1 = arith.extui %0 : i1 to i32
    %c0_i32_0 = arith.constant 0 : i32
    %2 = arith.cmpi ne, %1, %c0_i32_0 : i32
    scf.if %2 {
      %cst_8 = arith.constant 0.000000e+00 : f32
      %11 = vector.broadcast %cst_8 : f32 to vector<2x128xf32>
      %c0_9 = arith.constant 0 : index
      %c0_10 = arith.constant 0 : index
      %12 = vector.load %arg8[%c0_9, %c0_10] : memref<2x128xf32, #tpu.memory_space<vmem>>, vector<2x128xf32>
      tpu.vector_store %arg8[%c0_9, %c0_10], %11 {strides = array<i32>} : memref<2x128xf32, #tpu.memory_space<vmem>>, vector<2x128xf32>,
    } else {
    }
    %c0 = arith.constant 0 : index
    %c0_1 = arith.constant 0 : index
    %3 = vector.load %arg8[%c0, %c0_1] : memref<2x128xf32, #tpu.memory_space<vmem>>, vector<2x128xf32>
    %c0_2 = arith.constant 0 : index
    %c0_3 = arith.constant 0 : index
    %c0_4 = arith.constant 0 : index
    %4 = vector.load %arg2[%c0_2, %c0_3, %c0_4] : memref<2x8x128xf32, #tpu.memory_space<vmem>>, vector<2x8x128xf32>
    %cst = arith.constant dense<0.000000e+00> : vector<2x128xf32>
    %5 = vector.multi_reduction <add>, %4, %cst [1] : vector<2x8x128xf32> to vector<2x128xf32>
    %6 = arith.addf %3, %5 : vector<2x128xf32>
    %c0_5 = arith.constant 0 : index
    %c0_6 = arith.constant 0 : index
    %7 = vector.load %arg8[%c0_5, %c0_6] : memref<2x128xf32, #tpu.memory_space<vmem>>, vector<2x128xf32>
    tpu.vector_store %arg8[%c0_5, %c0_6], %6 {strides = array<i32>} : memref<2x128xf32, #tpu.memory_space<vmem>>, vector<2x128xf32>,
    %c1_i32 = arith.constant 1 : i32
    %8 = arith.cmpi eq, %arg1, %c1_i32 : i32
    %9 = arith.extui %8 : i1 to i32
    %c0_i32_7 = arith.constant 0 : i32
    %10 = arith.cmpi ne, %9, %c0_i32_7 : i32
    scf.if %10 {
      %c0_8 = arith.constant 0 : index
      %c0_9 = arith.constant 0 : index
      %11 = vector.load %arg8[%c0_8, %c0_9] : memref<2x128xf32, #tpu.memory_space<vmem>>, vector<2x128xf32>
      %cst_10 = arith.constant 6.250000e-02 : f32
      %12 = vector.broadcast %cst_10 : f32 to vector<2x128xf32>
      %13 = arith.mulf %11, %12 : vector<2x128xf32>
      %c0_11 = arith.constant 0 : index
      %c0_12 = arith.constant 0 : index
      %14 = vector.load %arg3[%c0_11, %c0_12] : memref<128x8xf32, #tpu.memory_space<vmem>>, vector<128x8xf32>
      %cst_13 = arith.constant dense<0.000000e+00> : vector<2x8xf32>
      %15 = tpu.matmul %13, %14, %cst_13 {dimension_numbers = #tpu.dot_dimension_numbers<[1], [0], [0], [1], [0, 0, 1, 1], [], []>} : vector<2x128xf32>, vector<128x8xf32>, vector<2x8xf32> -> vector<2x8xf32>
      %c0_14 = arith.constant 0 : index
      %c0_15 = arith.constant 0 : index
      %16 = vector.load %arg4[%c0_14, %c0_15] : memref<1x8xf32, #tpu.memory_space<vmem>>, vector<1x8xf32>
      %17 = vector.broadcast %16 : vector<1x8xf32> to vector<2x8xf32>
      %18 = arith.addf %15, %17 : vector<2x8xf32>
      %cst_16 = arith.constant 0.000000e+00 : f32
      %19 = vector.broadcast %cst_16 : f32 to vector<2x8xf32>
      %20 = arith.maximumf %18, %19 : vector<2x8xf32>
      %c0_17 = arith.constant 0 : index
      %c0_18 = arith.constant 0 : index
      %21 = vector.load %arg5[%c0_17, %c0_18] : memref<8x128xf32, #tpu.memory_space<vmem>>, vector<8x128xf32>
      %cst_19 = arith.constant dense<0.000000e+00> : vector<2x128xf32>
      %22 = tpu.matmul %20, %21, %cst_19 {dimension_numbers = #tpu.dot_dimension_numbers<[1], [0], [0], [1], [0, 0, 1, 1], [], []>} : vector<2x8xf32>, vector<8x128xf32>, vector<2x128xf32> -> vector<2x128xf32>
      %c0_20 = arith.constant 0 : index
      %c0_21 = arith.constant 0 : index
      %23 = vector.load %arg6[%c0_20, %c0_21] : memref<1x128xf32, #tpu.memory_space<vmem>>, vector<1x128xf32>
      %24 = vector.broadcast %23 : vector<1x128xf32> to vector<2x128xf32>
      %25 = arith.addf %22, %24 : vector<2x128xf32>
      %26 = arith.negf %25 : vector<2x128xf32>
      %27 = math.exp %26 : vector<2x128xf32>
      %cst_22 = arith.constant 1.000000e+00 : f32
      %28 = vector.broadcast %cst_22 : f32 to vector<2x128xf32>
      %29 = arith.addf %28, %27 : vector<2x128xf32>
      %30 = arith.divf %28, %29 : vector<2x128xf32>
      %c0_23 = arith.constant 0 : index
      %c0_24 = arith.constant 0 : index
      %31 = vector.load %arg7[%c0_23, %c0_24] : memref<2x128xf32, #tpu.memory_space<vmem>>, vector<2x128xf32>
      tpu.vector_store %arg7[%c0_23, %c0_24], %30 {strides = array<i32>} : memref<2x128xf32, #tpu.memory_space<vmem>>, vector<2x128xf32>,
    } else {
    }
    return
  }
  func.func @transform_0(%arg0: i32, %arg1: i32) -> (i32, i32, i32) {
    %c0_i32 = arith.constant 0 : i32
    %c0_i32_0 = arith.constant 0 : i32
    return %arg0, %arg1, %c0_i32 : i32, i32, i32
  }
  func.func @transform_1(%arg0: i32, %arg1: i32) -> (i32, i32) {
    %c0_i32 = arith.constant 0 : i32
    %c0_i32_0 = arith.constant 0 : i32
    %c0_i32_1 = arith.constant 0 : i32
    return %c0_i32, %c0_i32_0 : i32, i32
  }
  func.func @transform_2(%arg0: i32, %arg1: i32) -> (i32, i32) {
    %c0_i32 = arith.constant 0 : i32
    %c0_i32_0 = arith.constant 0 : i32
    %c0_i32_1 = arith.constant 0 : i32
    return %c0_i32, %c0_i32_0 : i32, i32
  }
  func.func @transform_3(%arg0: i32, %arg1: i32) -> (i32, i32) {
    %c0_i32 = arith.constant 0 : i32
    %c0_i32_0 = arith.constant 0 : i32
    %c0_i32_1 = arith.constant 0 : i32
    return %c0_i32, %c0_i32_0 : i32, i32
  }
  func.func @transform_4(%arg0: i32, %arg1: i32) -> (i32, i32) {
    %c0_i32 = arith.constant 0 : i32
    %c0_i32_0 = arith.constant 0 : i32
    %c0_i32_1 = arith.constant 0 : i32
    return %c0_i32, %c0_i32_0 : i32, i32
  }
  func.func @transform_5(%arg0: i32, %arg1: i32) -> (i32, i32) {
    %c0_i32 = arith.constant 0 : i32
    %c0_i32_0 = arith.constant 0 : i32
    return %arg0, %c0_i32 : i32, i32
  }
}

</mosaic_0001>

<bundles_post_ra>
// kernel: tpu_custom_call.1
= control target key start
LH: loop header
LB: loop body
LE: loop exit
PB: predicated region body
PF: predicated region fallthrough
CT: control target
= control target key end

     0   :  { %10 = vsyncpa [#allocation5], 0  ;;  %s815_s18 = smov 0   ;;  %s817_s19 = smov 0   ;;  %s964_s0 = inlined_call_operand.vmem [shape: f32[2,16,128], index: 0, kind: input, shape index: {}]   ;;  %s965_s1 = inlined_call_operand.vmem [shape: f32[128,8], index: 1, kind: input, shape index: {}]   ;;  %s966_s2 = inlined_call_operand.vmem [shape: f32[1,8], index: 2, kind: input, shape index: {}]   ;;  %s967_s3 = inlined_call_operand.vmem [shape: f32[8,128], index: 3, kind: input, shape index: {}]   ;;  %s968_s4 = inlined_call_operand.vmem [shape: f32[1,128], index: 4, kind: input, shape index: {}]   ;;  %s969_s5 = inlined_call_operand.hbm [shape: f32[2,128], index: 5, kind: output, shape index: {}]  }
   0x1   :  { %s819_s20 = smov 0   ;;  %s821_s21 = smov 0  }
   0x2   :  { %s823_s22 = smov 0  }
   0x3 LB: > { %s555_s23 = sadd.s32 4294967295, %s778_s22   ;;  %s25_s24 = sadd.s32 1, %s774_s21  ;;  %s778_s22 = sphi %s823_s22, %s16_s22   ;;  %s774_s21 = sphi %s821_s21, %s974_s21   ;;  %s770_s20 = sphi %s819_s20, %s973_s20   ;;  %s766_s19 = sphi %s817_s19, %s972_s19   ;;  %s762_s18 = sphi %s815_s18, %s971_s18  }
   0x4   : > { %p26_p0 = scmp.ge.s32.totalorder %s25_s24, 2  ;;  %p44_p1 = scmp.ne.s32.totalorder %s766_s19, %s762_s18 }
   0x5   : > { %p45_p2 = scmp.eq.s32.totalorder %s778_s22, 0  ;;  %s37_s26 = sadd.s32 1, %s766_s19 }
   0x6   : > { %s976_s24 = smov (%p26_p0, %s25_s24), 0  ;;  %p557_p5 = scmp.ge.s32.totalorder %s778_s22, 2 }
   0x7   : > { %p46_p3 = por %p45_p2, %p44_p1  ;;  %s33_s25 = ssub.s32 %s774_s21, %s976_s24 }
   0x8   : > { %p35_p4 = scmp.eq.s32.totalorder %s33_s25, 0  ;;  %192 = sbr.rel (%p557_p5) target bundleno = 22 (0x16), region = 32 }
   0xa   : > { %s851_s27 = scalar_select %p35_p4, %s766_s19, %s37_s26  }
   0xf   : > { %195 = sbr.rel (!%p46_p3) target bundleno = 22 (0x16), region = 36  ;;  %s197_s28 = sand.u32 (%p46_p3), 1, %s766_s19  }
  0x10   : > { %s559_s29 = sshll.u32 (%p46_p3), %s774_s21, 3  ;;  %s558_s30 = sshll.u32 (%p46_p3), %s197_s28, 4 }
  0x11   : > { %s204_s8 = scalar_lea.vmem (%p46_p3), %s964_s0, %s559_s29  ;;  %s199_s9 = scalar_lea.vmem (%p46_p3), [#allocation3], %s558_s30 }
  0x12   : > { %v234_v0 = vld [vmem:[%s204_s8] sm:$0xff] (%p46_p3)  ;;  %v236_v1 = vld [vmem:[%s204_s8 + $0x10] sm:$0xff] (%p46_p3) }
  0x13   : > { %235 = vst [vmem:[%s199_s9] sm:$0xff] (%p46_p3), %v234_v0  ;;  %237 = vst [vmem:[%s199_s9 + $0x8] sm:$0xff] (%p46_p3), %v236_v1 }
  0x16 PF: > { %p560_p6 = scmp.ge.s32.totalorder %s778_s22, 1  ;;  %p242_p7 = scmp.lt.s32.totalorder %s778_s22, 3 }
  0x18   : > { %p243_p8 = pnand %p560_p6, %p242_p7 }
  0x19   : > { %s249_s10 = sand.u32 (!%p243_p8), 1, %s762_s18   ;;  %p562_p9 = scmp.ne.s32.totalorder (!%p243_p8), %s770_s20, 0 }
  0x1a   : > { %246 = sbr.rel (%p243_p8) target bundleno = 558 (0x22e), region = 74  ;;  %s561_s11 = sshll.u32 (!%p243_p8), %s249_s10, 4 }
  0x1b   : > { %s251_s12 = scalar_lea.vmem (!%p243_p8), [#allocation3], %s561_s11 }
  0x21   : > { %275 = sbr.rel (%p562_p9) target bundleno = 40 (0x28), region = 82  ;;  %v780_v2 = vmov (!%p562_p9), 0.0  }
  0x22   : > { %276 = vst [vmem:[#allocation2] sm:$0x3] (!%p562_p9), %v780_v2 }
  0x28 PF: > { %v278_v3 = vld [vmem:[%s251_s12] sm:$0xff]  ;;  %v279_v4 = vld [vmem:[%s251_s12 + $0x8] sm:$0xff]  ;;  %vm294_vm0 = vcmask 1041409   ;;  %p563_p10 = scmp.ne.s32.totalorder %s770_s20, 1 }
  0x29   : > { %v280_v5 = vrot.slane %v278_v3, 4  ;;  %v286_v6 = vrot.slane %v279_v4, 4  ;;  %v277_v15 = vld [vmem:[#allocation2] sm:$0x3]  ;;  %v306_v21 = vld [vmem:[%s965_s1 + $0x8] sm:$0xff] (!%p563_p10)  ;;  %v307_v22 = vld [vmem:[%s965_s1 + $0x10] sm:$0xff] (!%p563_p10) }
  0x2a   : > { %v305_v20 = vld [vmem:[%s965_s1] sm:$0xff] (!%p563_p10)  ;;  %v781_v23 = vmov (!%p563_p10), 0.0|0.0   ;;  %v308_v25 = vld [vmem:[%s965_s1 + $0x18] sm:$0xff] (!%p563_p10)  ;;  %vm782_vm1 = vmmov (!%p563_p10), 0   ;;  %v783_v26 = vmov (!%p563_p10), 0.0   ;;  %v310_v29 = vld [vmem:[%s965_s1 + $0x28] sm:$0xff] (!%p563_p10) }
  0x2b   : > { %v281_v7 = vadd.f32 %v280_v5, %v278_v3  ;;  %v287_v8 = vadd.f32 %v286_v6, %v279_v4  ;;  %631 = vmatprep.subr.bf16.mxu0 (!%p563_p10), %v781_v23  ;;  %v632_v24 = vpack.c.bf16 (!%p563_p10), %v306_v21, %v305_v20  ;;  %623 = vmatprep.mubr.msk.f32.mxu0 (!%p563_p10), %vm782_vm1, %v783_v26  ;;  %v309_v28 = vld [vmem:[%s965_s1 + $0x20] sm:$0xff] (!%p563_p10)  ;;  %v311_v31 = vld [vmem:[%s965_s1 + $0x30] sm:$0xff] (!%p563_p10)  ;;  %v312_v32 = vld [vmem:[%s965_s1 + $0x38] sm:$0xff] (!%p563_p10)  ;;  %vm407_vm2 = vcmask (!%p563_p10), 64512  }
  0x2c   : > { %626 = vmatprep.subr.mxu1 (!%p563_p10), %v783_v26  ;;  %628 = vmatprep.mubr.msk.f32.mxu1 (!%p563_p10), %vm782_vm1, %v783_v26  ;;  %v635_v27 = vpack.c.bf16 (!%p563_p10), %v308_v25, %v307_v22  ;;  %v638_v30 = vpack.c.bf16 (!%p563_p10), %v310_v29, %v309_v28  ;;  %v641_v33 = vpack.c.bf16 (!%p563_p10), %v312_v32, %v311_v31  ;;  %v313_v34 = vld [vmem:[%s965_s1 + $0x40] sm:$0xff] (!%p563_p10)  ;;  %v314_v35 = vld [vmem:[%s965_s1 + $0x48] sm:$0xff] (!%p563_p10)  ;;  %v315_v37 = vld [vmem:[%s965_s1 + $0x50] sm:$0xff] (!%p563_p10) }
  0x2d   : > { %v282_v9 = vrot.slane %v281_v7, 2  ;;  %v288_v10 = vrot.slane %v287_v8, 2  ;;  %633 = vmatpush3.bf16.msra.mxu0 (!%p563_p10), %v632_v24  ;;  %v644_v36 = vpack.c.bf16 (!%p563_p10), %v314_v35, %v313_v34  ;;  %v316_v38 = vld [vmem:[%s965_s1 + $0x58] sm:$0xff] (!%p563_p10)  ;;  %v317_v40 = vld [vmem:[%s965_s1 + $0x60] sm:$0xff] (!%p563_p10)  ;;  %v318_v41 = vld [vmem:[%s965_s1 + $0x68] sm:$0xff] (!%p563_p10) }
  0x2e   : > { %634 = vmatprep.subr.bf16.mxu0 (!%p563_p10), %v781_v23  ;;  %v647_v39 = vpack.c.bf16 (!%p563_p10), %v316_v38, %v315_v37  ;;  %v650_v42 = vpack.c.bf16 (!%p563_p10), %v318_v41, %v317_v40  ;;  %v319_v43 = vld [vmem:[%s965_s1 + $0x70] sm:$0xff] (!%p563_p10)  ;;  %v320_v44 = vld [vmem:[%s965_s1 + $0x78] sm:$0xff] (!%p563_p10)  ;;  %v399_v48 = vld [vmem:[%s967_s3] sm:$0xff] (!%p563_p10) }
  0x2f   : > { %v283_v11 = vadd.f32 %v282_v9, %v281_v7  ;;  %v289_v12 = vadd.f32 %v288_v10, %v287_v8  ;;  %v653_v45 = vpack.c.bf16 (!%p563_p10), %v320_v44, %v319_v43  ;;  %627 = vmatpush3.msra.mxu1 (!%p563_p10), %v399_v48  ;;  %v564_v49 = vld [vmem:[%s966_s2] ss:$0 sm:$0xff] (!%p563_p10) }
  0x30   : > { %v565_v54 = vld [vmem:[%s968_s4] ss:$0 sm:$0xff] (!%p563_p10) }
  0x31   : > { %v284_v13 = vrot.slane %v283_v11, 1  ;;  %v290_v14 = vrot.slane %v289_v12, 1  ;;  %636 = vmatpush3.bf16.msra.mxu0 (!%p563_p10), %v635_v27 }
  0x32   : > { %302 = sbr.rel (%p563_p10) target bundleno = 533 (0x215), region = 86  ;;  %637 = vmatprep.subr.bf16.mxu0 (!%p563_p10), %v781_v23 }
  0x33   : > { %v285_v16 = vadd.f32 %v284_v13, %v283_v11  ;;  %v291_v17 = vadd.f32 %v290_v14, %v289_v12 }
  0x35   : > { %v295_v18 = vsel %vm294_vm0, %v291_v17, %v285_v16  ;;  %639 = vmatpush3.bf16.msra.mxu0 (!%p563_p10), %v638_v30 }
  0x36   : > { %v297_v19 = vadd.f32 %v295_v18, %v277_v15  ;;  %640 = vmatprep.subr.bf16.mxu0 (!%p563_p10), %v781_v23 }
  0x38   : > { %298 = vst [vmem:[#allocation2] sm:$0x3] %v297_v19 }
  0x39   : > { %642 = vmatpush3.bf16.msra.mxu0 %v641_v33 }
  0x3a   : > { %643 = vmatprep.subr.bf16.mxu0 %v781_v23 }
  0x3d   : > { %645 = vmatpush3.bf16.msra.mxu0 %v644_v36 }
  0x3e   : > { %646 = vmatprep.subr.bf16.mxu0 %v781_v23 }
  0x3f   : > { %v303_v46 = vld [vmem:[#allocation2] sm:$0x3] }
  0x40   : > { %v304_v47 = vmul.f32 0.0625, %v303_v46 }
  0x41   : > { %648 = vmatpush3.bf16.msra.mxu0 %v647_v39 }
  0x42   : > { %649 = vmatprep.subr.bf16.mxu0 %v781_v23 }
  0x45   : > { %651 = vmatpush3.bf16.msra.mxu0 %v650_v42 }
  0x46   : > { %652 = vmatprep.subr.bf16.mxu0 %v781_v23 }
  0x49   : > { %654 = vmatpush3.bf16.msra.mxu0 %v653_v45 }
  0x4c   : > { %624 = vmatmul.mubr.f32.vlgmr.msra.gmra.mrb[0].mxu0 %v304_v47 }
 0x11f   : > { %v394_v50 = vpop.f32.mrb[0].mxu0 }
 0x120   : > { %v395_v51 = vadd.f32 %v564_v49, %v394_v50  ;;  %v625_v52 = vpop.f32.mrb[1].mxu0 }
 0x122   : > { %v398_v53 = vmax.f32 %v395_v51, 0.0 }
 0x124   : > { %629 = vmatmul.mubr.msk.f32.vlgmr.msra.gmra.mrb[0].mxu1 %vm407_vm2, %v398_v53 }
 0x1f7   : > { %v477_v55 = vpop.f32.mrb[0].mxu1 }
 0x1f8   : > { %v478_v56 = vadd.f32 %v565_v54, %v477_v55  ;;  %v630_v57 = vpop.f32.mrb[1].mxu1 }
 0x1fa   : > { %v567_v58 = vmul.f32 -1.442695, %v478_v56 }
 0x1fc   : > { %706 = vpow2.f32 %v567_v58 }
 0x206   : > { %v707_v59 = vpop.eup %706 }
 0x207   : > { %v484_v60 = vadd.f32 1.0, %v707_v59 }
 0x209   : > { %708 = vrcp.f32 %v484_v60 }
 0x213   : > { %v709_v61 = vpop.eup %708 }
 0x214   : > { %487 = vst [vmem:[#allocation4] sm:$0x3] %v709_v61 }
 0x215 PF: > { %p923_p11 = scmp.eq.s32.totalorder %s555_s23, 1  ;;  %s784_s14 = smov [#allocation4]  }
 0x216   : > { %s497_s15 = sshll.u32 %s784_s14, 4  ;;  %s498_s15 = int_to_ptr.vmem [resolvable:$true] %s497_s15 }
 0x217   : > { %s710_s16 = scalar_lea.vmem %s498_s15, 32  ;;  %p717_p1 = scmp.lt.s32.totalorder %s498_s15, %s498_s15 }
 0x218   : > { %p711_p12 = scmp.ne.s32.totalorder %s498_s15, %s710_s16  ;;  %p718_p2 = scmp.lt.s32.totalorder %s710_s16, %s710_s16 }
 0x21a   : > { %p712_p13 = pnand %p711_p12, %p923_p11  ;;  %p719_p3 = por %p718_p2, %p717_p1 }
 0x21c   : > { %p713_p0 = pneg %p712_p13 }
 0x21e   : > { %p720_p4 = pnand %p719_p3, %p713_p0 }
 0x220   : > { %723 = shalt.err (!%p720_p4)
}
 0x221   : > { %s724_s23 = scalar_lea.hbm %s969_s5, 32 }
 0x222   : > { %p725_p5 = scmp.ne.s32.totalorder %s969_s5, %s724_s23  ;;  %p730_p8 = scmp.lt.u32.totalorder %s724_s23, %s969_s5 }
 0x224   : > { %p726_p6 = pnand %p725_p5, %p923_p11 }
 0x226   : > { %p727_p7 = pneg %p726_p6 }
 0x228   : > { %p732_p9 = pnand %p730_p8, %p727_p7 }
 0x22a   : > { %735 = shalt.err (!%p732_p9)
}
 0x22b   : > { %656 = dma.vmem_to_hbm [thread:$0]  (%p923_p11), %s498_s15, 32, %s969_s5, [#allocation5]  }
 0x22c   : > { %757 = dma.done.wait (%p923_p11), [#allocation5], 32  }
 0x22d   : > { %759 = vsyncadd (%p923_p11), [#allocation5], 4294967264 }
 0x22e PF: > { %s16_s22 = sadd.s32 1, %s778_s22   ;;  %s971_s18 = smov %s766_s19 }
 0x22f   : > { %p13_p10 = scmp.ge.s32.totalorder %s16_s22, 4   ;;  %s972_s19 = smov %s851_s27 }
 0x230   : > { %s973_s20 = smov %s774_s21  ;;  %s974_s21 = smov %s976_s24 }
 0x231   :  { %15 = sbr.rel (!%p13_p10) target bundleno = 3 (0x3), region = 119 }
 0x238   :  { %510 = vsyncpa [#allocation5], 1 }
 0x239   :  { %512 = vsyncpa [#allocation5 + $0x1], 1 }

</bundles_post_ra>
